<compile_context>
chip_gen: v7x
topology: tpu7x:2x2x1
jax: 0.10.0
libtpu: 0.0.40
codegen_flags: <defaults>
</compile_context>

<pallas_src>
import jax
import jax.numpy as jnp
from jax.experimental import pallas as pl
from jax.experimental.pallas import tpu as pltpu


def _round_up(x, m):
    return ((x + m - 1) // m) * m


def _mish_fast(x):
    """Mish(x) = x * tanh(softplus(x)) = x * (s^2 + 2s) / (s^2 + 2s + 2), s = e^x.

    One exp + one approx reciprocal (both on the EUP slot).  Clamp keeps exp
    finite; for x > 20, mish(x) == x to f32 precision.  (If downstream is
    accuracy-sensitive, approx=False is essentially free at this roofline.)
    """
    xs = jnp.minimum(x, 20.0)
    s = jnp.exp(xs)
    num = s * (s + 2.0)
    t = num * pl.reciprocal(num + 2.0, approx=True)
    return jnp.where(x > 20.0, x, x * t)


def _mish_exact(x):
    """Reference Mish (overflow-safe)."""
    return x * jnp.tanh(jnp.logaddexp(x, 0.0))


def dynamics_mlp_kernel(s_ref, a_ref, w1s_ref, w1a_ref, b1_ref,
                        w2_ref, b2_ref, w3_ref, b3_ref, out_ref):
    # Layer 1 — concat fused: x @ w1 == state @ w1_state + action @ w1_action.
    # .astype(bf16) is a no-op if the producer already hands us bf16.
    s_bf = s_ref[...].astype(jnp.bfloat16)
    a_bf = a_ref[...].astype(jnp.bfloat16)
    h = (jnp.dot(s_bf, w1s_ref[...], preferred_element_type=jnp.float32)
         + jnp.dot(a_bf, w1a_ref[...], preferred_element_type=jnp.float32)
         + b1_ref[...])
    h = _mish_fast(h)

    # Layer 2 — bf16 MXU inputs, f32 accumulation.
    h = jnp.dot(h.astype(jnp.bfloat16), w2_ref[...],
                preferred_element_type=jnp.float32) + b2_ref[...]
    h = _mish_fast(h)

    # Output layer (Identity) — tiny, kept in f32 for accuracy.
    # NOTE: padded rows of a partial last batch block flow through exp() but
    # are never written back, so any garbage there is harmless.
    o = jnp.dot(h, w3_ref[...], preferred_element_type=jnp.float32) + b3_ref[...]
    out_ref[...] = o.astype(out_ref.dtype)


def _pick_batch_tile(B, tb_max):
    """Largest batch tile that (a) amortizes the ~0.35 us per-grid-step
    overhead and (b) leaves >=2 grid steps when B is large enough, so v7x's
    two TensorCores both get work under dimension_semantics=("parallel",)."""
    TB = min(tb_max, B)
    if B > 16:  # enough rows to be worth splitting across cores
        TB = min(TB, _round_up(pl.cdiv(B, 2), 8))
    return max(TB, 1)


def dynamics_mlp_forward(state, action, params, *, tb=8192):
    """state: (B, To, Do), action: (B, Ta, Da)  ->  (B, Do) float32."""
    B, To, Do = state.shape
    _, Ta, Da = action.shape
    # Contiguous reshapes only (free in XLA); no concat is materialized.
    s_flat = state.reshape(B, To * Do)
    a_flat = action.reshape(B, Ta * Da)

    w1s, w1a = params["w1_state"], params["w1_action"]
    b1 = params["b1"]
    w2, b2 = params["w2"], params["b2"]
    w3, b3 = params["w3"], params["b3"]
    h1 = w1s.shape[1]
    h2 = w2.shape[1]

    TB = _pick_batch_tile(B, tb)
    grid = (pl.cdiv(B, TB),)

    def row_spec(feat):
        return pl.BlockSpec((TB, feat), lambda i: (i, 0))

    def const_spec(shape):
        return pl.BlockSpec(shape, lambda i: (0,) * len(shape))

    weights = (w1s, w1a, b1, w2, b2, w3, b3)
    weight_bytes = sum(int(w.size) * w.dtype.itemsize for w in weights)
    cost = pl.CostEstimate(
        flops=2 * B * (To * Do * h1 + Ta * Da * h1 + h1 * h2 + h2 * Do),
        transcendentals=2 * B * (h1 + h2),  # exp + reciprocal per hidden unit
        bytes_accessed=(B * (To * Do * s_flat.dtype.itemsize
                             + Ta * Da * a_flat.dtype.itemsize
                             + Do * 4)
                        + weight_bytes),
    )

    out = pl.pallas_call(
        dynamics_mlp_kernel,
        out_shape=jax.ShapeDtypeStruct((B, Do), jnp.float32),
        grid=grid,
        in_specs=[
            row_spec(To * Do),        # state (flattened)
            row_spec(Ta * Da),        # action (flattened)
            const_spec(w1s.shape),    # w1_state
            const_spec(w1a.shape),    # w1_action
            const_spec(b1.shape),
            const_spec(w2.shape),
            const_spec(b2.shape),
            const_spec(w3.shape),
            const_spec(b3.shape),
        ],
        out_specs=row_spec(Do),
        compiler_params=pltpu.CompilerParams(
            dimension_semantics=("parallel",),
            # Explicit scoped-VMEM budget so large batch tiles stay safe on
            # v7x (64 MiB physical / 32 MiB scoped default). Our footprint at
            # TB=8192 is only a few MiB, so this is ample headroom.
            vmem_limit_bytes=32 * 1024 * 1024,
        ),
        cost_estimate=cost,
    )(s_flat, a_flat, w1s, w1a, b1, w2, b2, w3, b3)
    return out


def init_params(key, obs_dim, action_dim, cond_steps, horizon_steps, mlp_dims):
    """nn.Linear-style uniform init; weights stored as (in, out).

    Returns (kernel_params, f32_reference_params).  Kernel params keep layer-1/2
    weights in bf16 (MXU-native) with w1 split into state/action halves.
    """
    Ds = obs_dim * cond_steps
    Da = action_dim * horizon_steps
    dims = [Ds + Da] + list(mlp_dims) + [obs_dim]

    def lin(kw, kb, fan_in, fan_out):
        bound = 1.0 / jnp.sqrt(fan_in)
        w = jax.random.uniform(kw, (fan_in, fan_out), jnp.float32, -bound, bound)
        b = jax.random.uniform(kb, (1, fan_out), jnp.float32, -bound, bound)
        return w, b

    key, k1w, k1b, k2w, k2b, k3w, k3b = jax.random.split(key, 7)
    w1, b1 = lin(k1w, k1b, dims[0], dims[1])
    w2, b2 = lin(k2w, k2b, dims[1], dims[2])
    w3, b3 = lin(k3w, k3b, dims[2], dims[3])

    kernel_params = {
        "w1_state": w1[:Ds].astype(jnp.bfloat16),
        "w1_action": w1[Ds:].astype(jnp.bfloat16),
        "b1": b1,
        "w2": w2.astype(jnp.bfloat16),
        "b2": b2,
        "w3": w3,        # final layer stays f32
        "b3": b3,
    }
    ref_params = {"w1": w1, "b1": b1, "w2": w2, "b2": b2, "w3": w3, "b3": b3}
    return kernel_params, ref_params


def reference_forward(state, action, ref_params):
    """Pure-JAX f32 reference of the original module's math."""
    B = state.shape[0]
    x = jnp.concatenate([state.reshape(B, -1), action.reshape(B, -1)], axis=-1)
    h = _mish_exact(x @ ref_params["w1"] + ref_params["b1"])
    h = _mish_exact(h @ ref_params["w2"] + ref_params["b2"])
    return h @ ref_params["w3"] + ref_params["b3"]


if __name__ == "__main__":
    # Small shapes consistent with the module:
    #   obs_dim=8, action_dim=4, cond_steps=To=2, horizon_steps=Ta=4, mlp_dims=[64, 64]
    # B=64 exercises the multi-step grid path (TB=32, grid=(2,)).
    B, To, Do = 64, 2, 8
    Ta, Da = 4, 4
    obs_dim, action_dim = Do, Da
    mlp_dims = [64, 64]

    key = jax.random.PRNGKey(0)
    k_state, k_action, k_params = jax.random.split(key, 3)
    state = jax.random.normal(k_state, (B, To, Do), jnp.float32)
    action = jax.random.normal(k_action, (B, Ta, Da), jnp.float32)
    params, ref_params = init_params(
        k_params, obs_dim, action_dim, To, Ta, mlp_dims)

    out = dynamics_mlp_forward(state, action, params)
    out = jax.block_until_ready(out)

    ref = reference_forward(state, action, ref_params)
    assert out.shape == (B, Do)
    # bf16 hidden matmuls + approx reciprocal in Mish => looser tolerance vs f32 ref.
    assert jnp.allclose(out, ref, atol=5e-2, rtol=5e-2), "Pallas output mismatch"

    print("KERNEL_OK")
</pallas_src>

<mosaic_0001>
module attributes {stable_mosaic.version = 11 : i64} {
  func.func @dynamics_mlp_kernel(%arg0: i32, %arg1: memref<32x16xf32, #tpu.memory_space<vmem>>, %arg2: memref<32x16xf32, #tpu.memory_space<vmem>>, %arg3: memref<16x64xbf16, #tpu.memory_space<vmem>>, %arg4: memref<16x64xbf16, #tpu.memory_space<vmem>>, %arg5: memref<1x64xf32, #tpu.memory_space<vmem>>, %arg6: memref<64x64xbf16, #tpu.memory_space<vmem>>, %arg7: memref<1x64xf32, #tpu.memory_space<vmem>>, %arg8: memref<64x8xf32, #tpu.memory_space<vmem>>, %arg9: memref<1x8xf32, #tpu.memory_space<vmem>>, %arg10: memref<32x8xf32, #tpu.memory_space<vmem>>) attributes {dimension_semantics = [#tpu.dimension_semantics<parallel>], iteration_bounds = array<i64: 2>, scalar_prefetch = 0 : i64, scratch_operands = 0 : i64, tpu.core_type = #tpu.core_type<tc>, window_params = [{transform_indices = @transform_0, window_bounds = array<i64: 32, 16>}, {transform_indices = @transform_1, window_bounds = array<i64: 32, 16>}, {pipeline_mode = #tpu.pipeline_mode<synchronous>, transform_indices = @transform_2, window_bounds = array<i64: 16, 64>}, {pipeline_mode = #tpu.pipeline_mode<synchronous>, transform_indices = @transform_3, window_bounds = array<i64: 16, 64>}, {pipeline_mode = #tpu.pipeline_mode<synchronous>, transform_indices = @transform_4, window_bounds = array<i64: 1, 64>}, {pipeline_mode = #tpu.pipeline_mode<synchronous>, transform_indices = @transform_5, window_bounds = array<i64: 64, 64>}, {pipeline_mode = #tpu.pipeline_mode<synchronous>, transform_indices = @transform_6, window_bounds = array<i64: 1, 64>}, {pipeline_mode = #tpu.pipeline_mode<synchronous>, transform_indices = @transform_7, window_bounds = array<i64: 64, 8>}, {pipeline_mode = #tpu.pipeline_mode<synchronous>, transform_indices = @transform_8, window_bounds = array<i64: 1, 8>}, {transform_indices = @transform_9, window_bounds = array<i64: 32, 8>}]} {
    %c0 = arith.constant 0 : index
    %c0_0 = arith.constant 0 : index
    %0 = vector.load %arg1[%c0, %c0_0] : memref<32x16xf32, #tpu.memory_space<vmem>>, vector<32x16xf32>
    %1 = arith.truncf %0 : vector<32x16xf32> to vector<32x16xbf16>
    %c0_1 = arith.constant 0 : index
    %c0_2 = arith.constant 0 : index
    %2 = vector.load %arg2[%c0_1, %c0_2] : memref<32x16xf32, #tpu.memory_space<vmem>>, vector<32x16xf32>
    %3 = arith.truncf %2 : vector<32x16xf32> to vector<32x16xbf16>
    %c0_3 = arith.constant 0 : index
    %c0_4 = arith.constant 0 : index
    %4 = vector.load %arg3[%c0_3, %c0_4] : memref<16x64xbf16, #tpu.memory_space<vmem>>, vector<16x64xbf16>
    %cst = arith.constant dense<0.000000e+00> : vector<32x64xf32>
    %5 = tpu.matmul %1, %4, %cst {dimension_numbers = #tpu.dot_dimension_numbers<[1], [0], [0], [1], [0, 0, 1, 1], [], []>} : vector<32x16xbf16>, vector<16x64xbf16>, vector<32x64xf32> -> vector<32x64xf32>
    %c0_5 = arith.constant 0 : index
    %c0_6 = arith.constant 0 : index
    %6 = vector.load %arg4[%c0_5, %c0_6] : memref<16x64xbf16, #tpu.memory_space<vmem>>, vector<16x64xbf16>
    %cst_7 = arith.constant dense<0.000000e+00> : vector<32x64xf32>
    %7 = tpu.matmul %3, %6, %cst_7 {dimension_numbers = #tpu.dot_dimension_numbers<[1], [0], [0], [1], [0, 0, 1, 1], [], []>} : vector<32x16xbf16>, vector<16x64xbf16>, vector<32x64xf32> -> vector<32x64xf32>
    %8 = arith.addf %5, %7 : vector<32x64xf32>
    %c0_8 = arith.constant 0 : index
    %c0_9 = arith.constant 0 : index
    %9 = vector.load %arg5[%c0_8, %c0_9] : memref<1x64xf32, #tpu.memory_space<vmem>>, vector<1x64xf32>
    %10 = vector.broadcast %9 : vector<1x64xf32> to vector<32x64xf32>
    %11 = arith.addf %8, %10 : vector<32x64xf32>
    %cst_10 = arith.constant 2.000000e+01 : f32
    %12 = vector.broadcast %cst_10 : f32 to vector<32x64xf32>
    %13 = arith.minimumf %11, %12 : vector<32x64xf32>
    %14 = math.exp %13 : vector<32x64xf32>
    %cst_11 = arith.constant 2.000000e+00 : f32
    %15 = vector.broadcast %cst_11 : f32 to vector<32x64xf32>
    %16 = arith.addf %14, %15 : vector<32x64xf32>
    %17 = arith.mulf %14, %16 : vector<32x64xf32>
    %cst_12 = arith.constant 2.000000e+00 : f32
    %18 = vector.broadcast %cst_12 : f32 to vector<32x64xf32>
    %19 = arith.addf %17, %18 : vector<32x64xf32>
    %20 = tpu.reciprocal %19 {approx = true} : vector<32x64xf32> -> vector<32x64xf32>
    %21 = arith.mulf %17, %20 : vector<32x64xf32>
    %cst_13 = arith.constant 2.000000e+01 : f32
    %22 = vector.broadcast %cst_13 : f32 to vector<32x64xf32>
    %23 = arith.cmpf ogt, %11, %22 : vector<32x64xf32>
    %24 = arith.mulf %11, %21 : vector<32x64xf32>
    %25 = arith.select %23, %11, %24 : vector<32x64xi1>, vector<32x64xf32>
    %26 = arith.truncf %25 : vector<32x64xf32> to vector<32x64xbf16>
    %c0_14 = arith.constant 0 : index
    %c0_15 = arith.constant 0 : index
    %27 = vector.load %arg6[%c0_14, %c0_15] : memref<64x64xbf16, #tpu.memory_space<vmem>>, vector<64x64xbf16>
    %cst_16 = arith.constant dense<0.000000e+00> : vector<32x64xf32>
    %28 = tpu.matmul %26, %27, %cst_16 {dimension_numbers = #tpu.dot_dimension_numbers<[1], [0], [0], [1], [0, 0, 1, 1], [], []>} : vector<32x64xbf16>, vector<64x64xbf16>, vector<32x64xf32> -> vector<32x64xf32>
    %c0_17 = arith.constant 0 : index
    %c0_18 = arith.constant 0 : index
    %29 = vector.load %arg7[%c0_17, %c0_18] : memref<1x64xf32, #tpu.memory_space<vmem>>, vector<1x64xf32>
    %30 = vector.broadcast %29 : vector<1x64xf32> to vector<32x64xf32>
    %31 = arith.addf %28, %30 : vector<32x64xf32>
    %cst_19 = arith.constant 2.000000e+01 : f32
    %32 = vector.broadcast %cst_19 : f32 to vector<32x64xf32>
    %33 = arith.minimumf %31, %32 : vector<32x64xf32>
    %34 = math.exp %33 : vector<32x64xf32>
    %cst_20 = arith.constant 2.000000e+00 : f32
    %35 = vector.broadcast %cst_20 : f32 to vector<32x64xf32>
    %36 = arith.addf %34, %35 : vector<32x64xf32>
    %37 = arith.mulf %34, %36 : vector<32x64xf32>
    %cst_21 = arith.constant 2.000000e+00 : f32
    %38 = vector.broadcast %cst_21 : f32 to vector<32x64xf32>
    %39 = arith.addf %37, %38 : vector<32x64xf32>
    %40 = tpu.reciprocal %39 {approx = true} : vector<32x64xf32> -> vector<32x64xf32>
    %41 = arith.mulf %37, %40 : vector<32x64xf32>
    %cst_22 = arith.constant 2.000000e+01 : f32
    %42 = vector.broadcast %cst_22 : f32 to vector<32x64xf32>
    %43 = arith.cmpf ogt, %31, %42 : vector<32x64xf32>
    %44 = arith.mulf %31, %41 : vector<32x64xf32>
    %45 = arith.select %43, %31, %44 : vector<32x64xi1>, vector<32x64xf32>
    %c0_23 = arith.constant 0 : index
    %c0_24 = arith.constant 0 : index
    %46 = vector.load %arg8[%c0_23, %c0_24] : memref<64x8xf32, #tpu.memory_space<vmem>>, vector<64x8xf32>
    %cst_25 = arith.constant dense<0.000000e+00> : vector<32x8xf32>
    %47 = tpu.matmul %45, %46, %cst_25 {dimension_numbers = #tpu.dot_dimension_numbers<[1], [0], [0], [1], [0, 0, 1, 1], [], []>} : vector<32x64xf32>, vector<64x8xf32>, vector<32x8xf32> -> vector<32x8xf32>
    %c0_26 = arith.constant 0 : index
    %c0_27 = arith.constant 0 : index
    %48 = vector.load %arg9[%c0_26, %c0_27] : memref<1x8xf32, #tpu.memory_space<vmem>>, vector<1x8xf32>
    %49 = vector.broadcast %48 : vector<1x8xf32> to vector<32x8xf32>
    %50 = arith.addf %47, %49 : vector<32x8xf32>
    %c0_28 = arith.constant 0 : index
    %c0_29 = arith.constant 0 : index
    %51 = vector.load %arg10[%c0_28, %c0_29] : memref<32x8xf32, #tpu.memory_space<vmem>>, vector<32x8xf32>
    tpu.vector_store %arg10[%c0_28, %c0_29], %50 {strides = array<i32>} : memref<32x8xf32, #tpu.memory_space<vmem>>, vector<32x8xf32>,
    return
  }
  func.func @transform_0(%arg0: i32) -> (i32, i32) {
    %c0_i32 = arith.constant 0 : i32
    %c0_i32_0 = arith.constant 0 : i32
    return %arg0, %c0_i32 : i32, i32
  }
  func.func @transform_1(%arg0: i32) -> (i32, i32) {
    %c0_i32 = arith.constant 0 : i32
    %c0_i32_0 = arith.constant 0 : i32
    return %arg0, %c0_i32 : i32, i32
  }
  func.func @transform_2(%arg0: i32) -> (i32, i32) {
    %c0_i32 = arith.constant 0 : i32
    %c0_i32_0 = arith.constant 0 : i32
    %c0_i32_1 = arith.constant 0 : i32
    return %c0_i32, %c0_i32_0 : i32, i32
  }
  func.func @transform_3(%arg0: i32) -> (i32, i32) {
    %c0_i32 = arith.constant 0 : i32
    %c0_i32_0 = arith.constant 0 : i32
    %c0_i32_1 = arith.constant 0 : i32
    return %c0_i32, %c0_i32_0 : i32, i32
  }
  func.func @transform_4(%arg0: i32) -> (i32, i32) {
    %c0_i32 = arith.constant 0 : i32
    %c0_i32_0 = arith.constant 0 : i32
    %c0_i32_1 = arith.constant 0 : i32
    return %c0_i32, %c0_i32_0 : i32, i32
  }
  func.func @transform_5(%arg0: i32) -> (i32, i32) {
    %c0_i32 = arith.constant 0 : i32
    %c0_i32_0 = arith.constant 0 : i32
    %c0_i32_1 = arith.constant 0 : i32
    return %c0_i32, %c0_i32_0 : i32, i32
  }
  func.func @transform_6(%arg0: i32) -> (i32, i32) {
    %c0_i32 = arith.constant 0 : i32
    %c0_i32_0 = arith.constant 0 : i32
    %c0_i32_1 = arith.constant 0 : i32
    return %c0_i32, %c0_i32_0 : i32, i32
  }
  func.func @transform_7(%arg0: i32) -> (i32, i32) {
    %c0_i32 = arith.constant 0 : i32
    %c0_i32_0 = arith.constant 0 : i32
    %c0_i32_1 = arith.constant 0 : i32
    return %c0_i32, %c0_i32_0 : i32, i32
  }
  func.func @transform_8(%arg0: i32) -> (i32, i32) {
    %c0_i32 = arith.constant 0 : i32
    %c0_i32_0 = arith.constant 0 : i32
    %c0_i32_1 = arith.constant 0 : i32
    return %c0_i32, %c0_i32_0 : i32, i32
  }
  func.func @transform_9(%arg0: i32) -> (i32, i32) {
    %c0_i32 = arith.constant 0 : i32
    %c0_i32_0 = arith.constant 0 : i32
    return %arg0, %c0_i32 : i32, i32
  }
}

</mosaic_0001>

<bundles_post_ra>
// kernel: tpu_custom_call.1
= control target key start
LH: loop header
LB: loop body
LE: loop exit
PB: predicated region body
PF: predicated region fallthrough
CT: control target
= control target key end

     0   :  { %s1105_s30 = smov 0   ;;  %s1187_s0 = inlined_call_operand.vmem [shape: f32[64,16], index: 0, kind: input, shape index: {}]   ;;  %s1188_s1 = inlined_call_operand.vmem [shape: f32[64,16], index: 1, kind: input, shape index: {}]   ;;  %s1189_s2 = inlined_call_operand.vmem [shape: bf16[16,64], index: 2, kind: input, shape index: {}]   ;;  %s1190_s3 = inlined_call_operand.vmem [shape: bf16[16,64], index: 3, kind: input, shape index: {}]   ;;  %s1191_s4 = inlined_call_operand.vmem [shape: f32[1,64], index: 4, kind: input, shape index: {}]   ;;  %s1192_s5 = inlined_call_operand.vmem [shape: bf16[64,64], index: 5, kind: input, shape index: {}]   ;;  %s1193_s6 = inlined_call_operand.vmem [shape: f32[1,64], index: 6, kind: input, shape index: {}]   ;;  %s1194_s7 = inlined_call_operand.vmem [shape: f32[64,8], index: 7, kind: input, shape index: {}]   ;;  %s1195_s8 = inlined_call_operand.vmem [shape: f32[1,8], index: 8, kind: input, shape index: {}]   ;;  %s1196_s9 = inlined_call_operand.vmem [shape: f32[64,8], index: 9, kind: output, shape index: {}]  }
   0x1 LB: > { %s879_s10 = sadd.s32 4294967295, %s1053_s30   ;;  %p883_p0 = scmp.ge.s32.totalorder %s1053_s30, 1  ;;  %s1053_s30 = sphi %s1105_s30, %s19_s30  }
   0x2   : > { %p299_p1 = scmp.lt.s32.totalorder %s1053_s30, 3 }
   0x4   : > { %p300_p2 = pnand %p883_p0, %p299_p1 }
   0x5   : > { %v1009_v0 = vld [vmem:[%s1190_s3] sm:$0xff] (!%p300_p2)   ;;  %s884_s13 = sshll.u32 (!%p300_p2), %s879_s10, 2  ;;  %vm381_vm0 = vcmask (!%p300_p2), 130048   ;;  %v1012_v15 = vld [vmem:[%s1192_s5 + $0x8] sm:$0xff] (!%p300_p2)   ;;  %v1013_v16 = vld [vmem:[%s1192_s5 + $0x10] sm:$0xff] (!%p300_p2)   ;;  %vm594_vm5 = vcmask (!%p300_p2), 523264  }
   0x6   : > { %303 = sbr.rel (%p300_p2) target bundleno = 754 (0x2f2), region = 56  ;;  %v1010_v1 = vld [vmem:[%s1189_s2] sm:$0xff] (!%p300_p2)   ;;  %p341_p3 = scmp.lt.s32.totalorder (!%p300_p2), %s884_s13, 7  ;;  %935 = vmatprep.subr.bf16.mxu1 (!%p300_p2), %v1009_v0  ;;  %v1014_v17 = vld [vmem:[%s1192_s5 + $0x18] sm:$0xff] (!%p300_p2)   ;;  %vm806_vm10 = vcmask (!%p300_p2), 64512  }
   0x7   : > { %941 = vmatprep.subr.bf16.mxu0 (!%p300_p2), %v1010_v1  ;;  %936 = vmatpush3.bf16.msra.mxu1 (!%p300_p2), %v1009_v0  ;;  %v1011_v14 = vld [vmem:[%s1192_s5] sm:$0xff] (!%p300_p2)  }
   0x8   : > { %942 = vmatpush3.bf16.msra.mxu0 (!%p300_p2), %v1010_v1  ;;  %947 = vmatprep.subr.bf16.mxu1 (!%p300_p2), %v1011_v14  ;;  %v896_v20 = vld [vmem:[%s1191_s4] ss:$0 sm:$0xff] (!%p300_p2) }
   0xd   : > { %s1198_s13 = smov (!%p341_p3, %s884_s13), 7 }
   0xe   : > { %s1119_s16 = sshll.u32 %s1198_s13, 3 }
   0xf   : > { %s350_s19 = scalar_lea.vmem %s1188_s1, %s1119_s16  ;;  %s344_s22 = scalar_lea.vmem %s1187_s0, %s1119_s16 }
  0x10   : > { %v365_v2 = vld [vmem:[%s350_s19] sm:$0xff]  ;;  %v366_v3 = vld [vmem:[%s350_s19 + $0x8] sm:$0xff]  ;;  %v367_v7 = vld [vmem:[%s350_s19 + $0x10] sm:$0xff]  ;;  %s356_s17 = scalar_lea.vmem %s1196_s9, %s1119_s16 }
  0x11   : > { %v359_v4 = vld [vmem:[%s344_s22] sm:$0xff]  ;;  %v369_v5 = vpack.c.bf16 %v366_v3, %v365_v2  ;;  %v360_v6 = vld [vmem:[%s344_s22 + $0x8] sm:$0xff]  ;;  %v368_v8 = vld [vmem:[%s350_s19 + $0x18] sm:$0xff] }
  0x12   : > { %v363_v9 = vpack.c.bf16 %v360_v6, %v359_v4  ;;  %v370_v10 = vpack.c.bf16 %v368_v8, %v367_v7  ;;  %v361_v11 = vld [vmem:[%s344_s22 + $0x10] sm:$0xff]  ;;  %v362_v12 = vld [vmem:[%s344_s22 + $0x18] sm:$0xff] }
  0x13   : > { %937 = vmatprep.mubr.msk.bf16.mxu1 %vm381_vm0, %v369_v5  ;;  %v364_v13 = vpack.c.bf16 %v362_v12, %v361_v11 }
  0x14   : > { %943 = vmatprep.mubr.msk.bf16.mxu0 %vm381_vm0, %v363_v9  ;;  %938 = vmatmul.mubr.msk.bf16.vlgmr.msra.gmra.mrb[0].mxu1 %vm381_vm0, %v370_v10 }
  0x15   : > { %944 = vmatmul.mubr.msk.bf16.vlgmr.msra.gmra.mrb[0].mxu0 %vm381_vm0, %v364_v13  ;;  %948 = vmatpush3.bf16.msra.mxu1 %v1011_v14  ;;  %v694_v13 = vld [vmem:[%s1194_s7] sm:$0xff]  ;;  %v695_v14 = vld [vmem:[%s1194_s7 + $0x8] sm:$0xff] }
  0x16   : > { %949 = vmatprep.subr.bf16.mxu1 %v1012_v15 }
  0x19   : > { %950 = vmatpush3.bf16.msra.mxu1 %v1012_v15  ;;  %v981_v15 = vpack.c.bf16 %v695_v14, %v694_v13 }
  0x1a   : > { %951 = vmatprep.subr.bf16.mxu1 %v1013_v16 }
  0x1b   : > { %982 = vmatprep.subr.bf16.mxu0 %v981_v15 }
  0x1c   : > { %984 = vmatpush3.bf16.msra.mxu0 %v981_v15 }
  0x1d   : > { %952 = vmatpush3.bf16.msra.mxu1 %v1013_v16  ;;  %v696_v16 = vld [vmem:[%s1194_s7 + $0x10] sm:$0xff] }
  0x1e   : > { %953 = vmatprep.subr.bf16.mxu1 %v1014_v17 }
  0x21   : > { %954 = vmatpush3.bf16.msra.mxu1 %v1014_v17  ;;  %v697_v17 = vld [vmem:[%s1194_s7 + $0x18] sm:$0xff] }
  0xe7   : > { %v939_v18 = vpop.f32.mrb[0].mxu1 }
  0xe8   : > { %v945_v19 = vpop.f32.mrb[0].mxu0  ;;  %v422_v21 = vpop.f32.mrb[1].mxu1 }
  0xe9   : > { %v492_v22 = vadd.f32 %v945_v19, %v939_v18  ;;  %v483_v23 = vpop.f32.mrb[1].mxu0  ;;  %v940_v24 = vpop.f32.mrb[2].mxu1  ;;  %v985_v18 = vpack.c.bf16 %v697_v17, %v696_v16  ;;  %v698_v19 = vld [vmem:[%s1194_s7 + $0x20] sm:$0xff] }
  0xea   : > { %v484_v25 = vadd.f32 %v483_v23, %v422_v21  ;;  %v946_v26 = vpop.f32.mrb[2].mxu0  ;;  %v425_v27 = vpop.f32.mrb[3].mxu1  ;;  %v701_v23 = vld [vmem:[%s1194_s7 + $0x38] sm:$0xff] }
  0xeb   : > { %v507_v28 = vadd.f32 %v896_v20, %v492_v22  ;;  %v495_v29 = vadd.f32 %v946_v26, %v940_v24  ;;  %v486_v30 = vpop.f32.mrb[3].mxu0  ;;  %986 = vmatprep.subr.bf16.mxu0 %v985_v18  ;;  %v700_v22 = vld [vmem:[%s1194_s7 + $0x30] sm:$0xff] }
  0xec   : > { %v505_v31 = vadd.f32 %v896_v20, %v484_v25  ;;  %v487_v32 = vadd.f32 %v486_v30, %v425_v27  ;;  %988 = vmatpush3.bf16.msra.mxu0 %v985_v18  ;;  %v993_v24 = vpack.c.bf16 %v701_v23, %v700_v22  ;;  %v897_v25 = vld [vmem:[%s1193_s6] ss:$0 sm:$0xff] }
  0xed   : > { %v511_v33 = vmin.f32 %v507_v28, 20.0  ;;  %v508_v34 = vadd.f32 %v896_v20, %v495_v29  ;;  %vm543_vm1 = vcmp.gt.f32.partialorder %v507_v28, 20.0 }
  0xee   : > { %v509_v35 = vmin.f32 %v505_v31, 20.0  ;;  %v506_v36 = vadd.f32 %v896_v20, %v487_v32  ;;  %vm541_vm3 = vcmp.gt.f32.partialorder %v505_v31, 20.0  ;;  %v699_v20 = vld [vmem:[%s1194_s7 + $0x28] sm:$0xff] }
  0xef   : > { %v517_v37 = vmul.f32 1.442695, %v511_v33  ;;  %v512_v38 = vmin.f32 %v508_v34, 20.0  ;;  %vm544_vm2 = vcmp.gt.f32.partialorder %v508_v34, 20.0  ;;  %v989_v21 = vpack.c.bf16 %v699_v20, %v698_v19 }
  0xf0   : > { %v513_v39 = vmul.f32 1.442695, %v509_v35  ;;  %v510_v40 = vmin.f32 %v506_v36, 20.0  ;;  %vm542_vm4 = vcmp.gt.f32.partialorder %v506_v36, 20.0 }
  0xf1   : > { %1015 = vpow2.f32 %v517_v37  ;;  %v519_v41 = vmul.f32 1.442695, %v512_v38  ;;  %990 = vmatprep.subr.bf16.mxu0 %v989_v21 }
  0xf2   : > { %1017 = vpow2.f32 %v513_v39  ;;  %v515_v42 = vmul.f32 1.442695, %v510_v40  ;;  %992 = vmatpush3.bf16.msra.mxu0 %v989_v21 }
  0xf3   : > { %1019 = vpow2.f32 %v519_v41  ;;  %994 = vmatprep.subr.bf16.mxu0 %v993_v24 }
  0xf4   : > { %1021 = vpow2.f32 %v515_v42 }
  0xf6   : > { %996 = vmatpush3.bf16.msra.mxu0 %v993_v24 }
  0xfb   : > { %v1016_v43 = vpop.eup %1015 }
  0xfc   : > { %v1018_v44 = vpop.eup %1017  ;;  %v523_v45 = vadd.f32 2.0, %v1016_v43 }
  0xfd   : > { %v1020_v46 = vpop.eup %1019  ;;  %v521_v47 = vadd.f32 2.0, %v1018_v44 }
  0xfe   : > { %v1022_v48 = vpop.eup %1021  ;;  %v527_v49 = vmul.f32 %v1016_v43, %v523_v45  ;;  %v524_v50 = vadd.f32 2.0, %v1020_v46 }
  0xff   : > { %v525_v51 = vmul.f32 %v1018_v44, %v521_v47  ;;  %v522_v52 = vadd.f32 2.0, %v1022_v48 }
 0x100   : > { %v531_v53 = vadd.f32 2.0, %v527_v49  ;;  %v528_v54 = vmul.f32 %v1020_v46, %v524_v50 }
 0x101   : > { %v529_v55 = vadd.f32 2.0, %v525_v51  ;;  %v526_v56 = vmul.f32 %v1022_v48, %v522_v52 }
 0x102   : > { %1023 = vrcp.f32 %v531_v53  ;;  %v532_v57 = vadd.f32 2.0, %v528_v54 }
 0x103   : > { %1025 = vrcp.f32 %v529_v55  ;;  %v530_v58 = vadd.f32 2.0, %v526_v56 }
 0x104   : > { %1027 = vrcp.f32 %v532_v57 }
 0x105   : > { %1029 = vrcp.f32 %v530_v58 }
 0x10c   : > { %v1024_v59 = vpop.eup %1023 }
 0x10d   : > { %v1026_v60 = vpop.eup %1025  ;;  %v539_v61 = vmul.f32 %v1024_v59, %v527_v49 }
 0x10e   : > { %v1028_v62 = vpop.eup %1027  ;;  %v537_v63 = vmul.f32 %v1026_v60, %v525_v51 }
 0x10f   : > { %v1030_v0 = vpop.eup %1029  ;;  %v547_v1 = vmul.f32 %v539_v61, %v507_v28  ;;  %v540_v2 = vmul.f32 %v1028_v62, %v528_v54 }
 0x110   : > { %v545_v3 = vmul.f32 %v537_v63, %v505_v31  ;;  %v538_v4 = vmul.f32 %v1030_v0, %v526_v56 }
 0x111   : > { %v548_v5 = vmul.f32 %v540_v2, %v508_v34  ;;  %v551_v7 = vsel %vm543_vm1, %v507_v28, %v547_v1 }
 0x112   : > { %v546_v6 = vmul.f32 %v538_v4, %v506_v36  ;;  %v549_v10 = vsel %vm541_vm3, %v505_v31, %v545_v3 }
 0x113   : > { %v552_v8 = vsel %vm544_vm2, %v508_v34, %v548_v5 }
 0x114   : > { %v554_v9 = vpack.c.bf16 %v552_v8, %v551_v7  ;;  %v550_v11 = vsel %vm542_vm4, %v506_v36, %v546_v6 }
 0x115   : > { %v553_v12 = vpack.c.bf16 %v550_v11, %v549_v10  ;;  %v904_v10 = vld [vmem:[%s1195_s8] ss:$0 sm:$0xff] }
 0x117   : > { %955 = vmatprep.mubr.msk.bf16.mxu1 %vm594_vm5, %v553_v12 }
 0x118   : > { %956 = vmatmul.mubr.msk.bf16.vlgmr.msra.gmra.mrb[4].mxu1 %vm594_vm5, %v554_v9 }
 0x1eb   : > { %v957_v26 = vpop.f32.mrb[4].mxu1 }
 0x1ec   : > { %v644_v27 = vadd.f32 %v957_v26, %v897_v25  ;;  %v635_v28 = vpop.f32.mrb[5].mxu1 }
 0x1ed   : > { %v636_v29 = vadd.f32 %v897_v25, %v635_v28  ;;  %v958_v30 = vpop.f32.mrb[6].mxu1 }
 0x1ee   : > { %v652_v31 = vmin.f32 %v644_v27, 20.0  ;;  %v647_v32 = vadd.f32 %v958_v30, %v897_v25  ;;  %v638_v33 = vpop.f32.mrb[7].mxu1  ;;  %vm684_vm8 = vcmp.gt.f32.partialorder %v644_v27, 20.0 }
 0x1ef   : > { %v650_v34 = vmin.f32 %v636_v29, 20.0  ;;  %v639_v35 = vadd.f32 %v897_v25, %v638_v33  ;;  %vm682_vm6 = vcmp.gt.f32.partialorder %v636_v29, 20.0 }
 0x1f0   : > { %v658_v36 = vmul.f32 1.442695, %v652_v31  ;;  %v653_v37 = vmin.f32 %v647_v32, 20.0  ;;  %vm685_vm9 = vcmp.gt.f32.partialorder %v647_v32, 20.0 }
 0x1f1   : > { %v654_v38 = vmul.f32 1.442695, %v650_v34  ;;  %v651_v39 = vmin.f32 %v639_v35, 20.0  ;;  %vm683_vm7 = vcmp.gt.f32.partialorder %v639_v35, 20.0 }
 0x1f2   : > { %1031 = vpow2.f32 %v658_v36  ;;  %v660_v40 = vmul.f32 1.442695, %v653_v37 }
 0x1f3   : > { %1033 = vpow2.f32 %v654_v38  ;;  %v656_v41 = vmul.f32 1.442695, %v651_v39 }
 0x1f4   : > { %1035 = vpow2.f32 %v660_v40 }
 0x1f5   : > { %1037 = vpow2.f32 %v656_v41 }
 0x1fc   : > { %v1032_v42 = vpop.eup %1031 }
 0x1fd   : > { %v1034_v43 = vpop.eup %1033  ;;  %v664_v44 = vadd.f32 2.0, %v1032_v42 }
 0x1fe   : > { %v1036_v45 = vpop.eup %1035  ;;  %v662_v46 = vadd.f32 2.0, %v1034_v43 }
 0x1ff   : > { %v1038_v47 = vpop.eup %1037  ;;  %v668_v48 = vmul.f32 %v1032_v42, %v664_v44  ;;  %v665_v49 = vadd.f32 2.0, %v1036_v45 }
 0x200   : > { %v663_v50 = vadd.f32 2.0, %v1038_v47  ;;  %v666_v51 = vmul.f32 %v1034_v43, %v662_v46 }
 0x201   : > { %v672_v52 = vadd.f32 2.0, %v668_v48  ;;  %v669_v53 = vmul.f32 %v1036_v45, %v665_v49 }
 0x202   : > { %v667_v54 = vmul.f32 %v1038_v47, %v663_v50  ;;  %v670_v55 = vadd.f32 2.0, %v666_v51 }
 0x203   : > { %1039 = vrcp.f32 %v672_v52  ;;  %v673_v56 = vadd.f32 2.0, %v669_v53 }
 0x204   : > { %v671_v57 = vadd.f32 2.0, %v667_v54  ;;  %1041 = vrcp.f32 %v670_v55 }
 0x205   : > { %1043 = vrcp.f32 %v673_v56 }
 0x206   : > { %1045 = vrcp.f32 %v671_v57 }
 0x20d   : > { %v1040_v58 = vpop.eup %1039 }
 0x20e   : > { %v1042_v59 = vpop.eup %1041  ;;  %v680_v60 = vmul.f32 %v1040_v58, %v668_v48 }
 0x20f   : > { %v1044_v61 = vpop.eup %1043  ;;  %v678_v62 = vmul.f32 %v1042_v59, %v666_v51 }
 0x210   : > { %v1046_v63 = vpop.eup %1045  ;;  %v681_v2 = vmul.f32 %v1044_v61, %v669_v53  ;;  %v688_v3 = vmul.f32 %v680_v60, %v644_v27 }
 0x211   : > { %v679_v0 = vmul.f32 %v1046_v63, %v667_v54  ;;  %v686_v1 = vmul.f32 %v678_v62, %v636_v29 }
 0x212   : > { %v689_v7 = vmul.f32 %v681_v2, %v647_v32  ;;  %v692_v8 = vsel %vm684_vm8, %v644_v27, %v688_v3 }
 0x213   : > { %v687_v4 = vmul.f32 %v679_v0, %v639_v35  ;;  %v690_v5 = vsel %vm682_vm6, %v636_v29, %v686_v1 }
 0x214   : > { %975 = vmatprep.mubr.msk.f32.mxu0 %vm594_vm5, %v690_v5  ;;  %v693_v9 = vsel %vm685_vm9, %v647_v32, %v689_v7 }
 0x215   : > { %v691_v6 = vsel %vm683_vm7, %v639_v35, %v687_v4 }
 0x216   : > { %976 = vmatmul.mubr.msk.f32.vlgmr.msra.gmra.mrb[4].mxu0 %vm594_vm5, %v691_v6 }
 0x217   : > { %978 = vmatprep.mubr.msk.f32.mxu0 %vm594_vm5, %v692_v8 }
 0x21a   : > { %979 = vmatmul.mubr.msk.f32.gmra.mrb[6].mxu0 %vm594_vm5, %v693_v9 }
 0x2e9   : > { %v977_v11 = vpop.f32.mrb[4].mxu0 }
 0x2ea   : > { %v787_v12 = vpop.f32.mrb[5].mxu0  ;;  %v793_v14 = vadd.f32 %v977_v11, %v904_v10 }
 0x2eb   : > { %v788_v13 = vadd.f32 %v904_v10, %v787_v12 }
 0x2ec   : > { %808 = vst.msk [vmem:[%s356_s17 + $0x8] sm:$0xff] %vm806_vm10, %v793_v14 }
 0x2ed   : > { %807 = vst.msk [vmem:[%s356_s17] sm:$0xff] %vm806_vm10, %v788_v13  ;;  %v980_v15 = vpop.f32.mrb[6].mxu0 }
 0x2ee   : > { %v797_v16 = vpop.f32.mrb[7].mxu0  ;;  %v803_v18 = vadd.f32 %v980_v15, %v904_v10 }
 0x2ef   : > { %v798_v17 = vadd.f32 %v904_v10, %v797_v16 }
 0x2f0   : > { %810 = vst.msk [vmem:[%s356_s17 + $0x18] sm:$0xff] %vm806_vm10, %v803_v18 }
 0x2f1   : > { %809 = vst.msk [vmem:[%s356_s17 + $0x10] sm:$0xff] %vm806_vm10, %v798_v17 }
 0x2f2 PF: > { %s19_s30 = sadd.s32 1, %s1053_s30  }
 0x2f3   : > { %p16_p4 = scmp.ge.s32.totalorder %s19_s30, 4  }
 0x2f5   :  { %18 = sbr.rel (!%p16_p4) target bundleno = 1 (0x1), region = 89 }

</bundles_post_ra>
